<compile_context>
chip_gen: v7x
topology: tpu7x:2x2x1
jax: 0.10.0
libtpu: 0.0.40
codegen_flags: <defaults>
</compile_context>

<pallas_src>
import functools
import numpy as np

import jax
import jax.numpy as jnp
from jax.experimental import pallas as pl
from jax.experimental.pallas import tpu as pltpu


# ----------------------------- filterbank construction (plain numpy glue) ---

def hz2mel(hz):
    return 2595.0 * np.log10(1.0 + hz / 700.0)


def mel2hz(mel):
    return 700.0 * (10.0 ** (mel / 2595.0) - 1)


def get_filterbanks(nfilt=20, nfft=512, samplerate=16000, lowfreq=0, highfreq=None):
    highfreq = highfreq or samplerate / 2
    assert highfreq <= samplerate / 2, 'highfreq is greater than samplerate/2'
    lowmel = hz2mel(lowfreq)
    highmel = hz2mel(highfreq)
    melpoints = np.linspace(lowmel, highmel, nfilt + 2)
    bin = np.floor((nfft + 1) * mel2hz(melpoints) / float(samplerate))
    fbank = np.zeros([nfilt, nfft // 2 + 1])
    for j in range(0, nfilt):
        for i in range(int(bin[j]), int(bin[j + 1])):
            fbank[j, i] = (i - bin[j]) / (bin[j + 1] - bin[j])
        for i in range(int(bin[j + 1]), int(bin[j + 2])):
            fbank[j, i] = (bin[j + 2] - i) / (bin[j + 2] - bin[j + 1])
    return fbank


# ----------------------------------------------------------- Pallas kernel --

def _fbank_kernel(x_ref, w_ref, cmvn_ref, o_ref, *, use_power, melfloor):
    """One M-tile of: (optional sqrt) -> x @ W -> clamp(melfloor) -> log -> cmvn."""
    x = x_ref[...]                                   # (TM, K) f32
    if not use_power:
        # clamp >= 0 keeps garbage rows of a partial boundary tile NaN-free
        # (power spectra are non-negative, so this is a no-op on real data).
        x = jnp.sqrt(jnp.maximum(x, 0.0))
    # MXU matmul. When w_ref is bf16 (opt-in fast path) the cast keeps the MXU
    # single-pass on v7x; accumulation stays f32 either way.
    fb = jnp.dot(x.astype(w_ref.dtype), w_ref[...],
                 preferred_element_type=jnp.float32)  # (TM, nbank) f32
    fb = jnp.maximum(fb, melfloor)                   # torch.clamp(min=melfloor)
    fb = jnp.log(fb)
    add = cmvn_ref[0:1, :]                           # fbank_cmvn[0, :]
    scale = cmvn_ref[1:2, :]                         # fbank_cmvn[1, :]
    o_ref[...] = ((fb + add) * scale).astype(o_ref.dtype)


def _round_up(x, m):
    return ((x + m - 1) // m) * m


def _cdiv(a, b):
    return (a + b - 1) // b


_TM_CAP = 2048      # x tile 2 MiB (x2 buffers) + out tile 320 KiB: well in VMEM
_MIN_STEPS = 4      # >= 2 double-buffered steps per TensorCore on 2-TC (v7x)


def _pick_tile_m(m):
    """M-tile size: big enough to amortize the ~0.35us per-step pipeline
    overhead, but keeping >= _MIN_STEPS grid steps (so both v7x TensorCores
    get overlapped DMA/compute) when the input is large enough; an exact
    8-aligned single tile for tiny inputs."""
    if m <= 256:
        return _round_up(max(m, 8), 8)
    tm = _TM_CAP
    while tm > 128 and _cdiv(m, tm) < _MIN_STEPS:
        tm //= 2
    # Prefer an even number of steps so a 2-TC split is balanced.
    steps = _cdiv(m, tm)
    if steps % 2 == 1 and steps >= _MIN_STEPS:
        even = steps + 1
        tm_even = _round_up(_cdiv(m, even), 8)
        if _cdiv(m, tm_even) == even:
            tm = tm_even
    return tm


class FbankModel:
    """JAX/Pallas port of make_data/model/fbanklayer.FbankModel (forward only)."""

    def __init__(self, nFFT=512, nbank=40, samplerate=16000, lowfreq=80,
                 highfreq=8000, usePower=1, takeLogs=1, melfloor=1.0, fixed=True,
                 bf16_mxu=False, out_dtype=jnp.float32):
        self.nFFT = nFFT
        self.nbank = nbank
        self.melfloor = float(melfloor)
        self.usePower = usePower
        self.takeLogs = takeLogs  # TODO(synk): takeLogs is unused in the reference forward (log always applied); kept for parity.
        self.fixed = fixed        # forward-only port: fixed vs trainable makes no difference here.
        self.nbin = nFFT // 2 + 1
        self.out_dtype = out_dtype

        fb = get_filterbanks(nfilt=nbank, nfft=nFFT, samplerate=samplerate,
                             lowfreq=lowfreq, highfreq=highfreq)      # (nbank, nbin)
        # nn.Linear(nbin, nbank, bias=False) weight layout is (out=nbank, in=nbin)
        self.weight = jnp.asarray(fb, dtype=jnp.float32)

        # Drop the Nyquist column when it is exactly zero (true for the default
        # highfreq == samplerate/2): K becomes a clean multiple of 128 and the
        # kernel reads ~33% less spectrum.  Fall back to the full bin count
        # (BlockSpec then uses the full array extent) if the check fails.
        if (self.nbin - 1) % 128 == 0 and np.all(fb[:, self.nbin - 1] == 0.0):
            self.k_eff = self.nbin - 1
        else:
            self.k_eff = self.nbin

        # Transposed weight (K, nbank), built once.  No lane padding: the last
        # block dim equals the full array extent, which is legal and keeps the
        # output store narrow.  bf16 operands are an opt-in (v7x) fast path.
        w_t = np.ascontiguousarray(fb[:, :self.k_eff].T.astype(np.float32))
        mxu_dtype = jnp.bfloat16 if bf16_mxu else jnp.float32
        self._w_t = jnp.asarray(w_t).astype(mxu_dtype)

        # Identity cmvn (add 0, scale 1), built once (no per-call pad kernel).
        cmvn_id = np.zeros((2, nbank), np.float32)
        cmvn_id[1, :] = 1.0
        self._cmvn_identity = jnp.asarray(cmvn_id)

    def __call__(self, audio_spect, fbank_cmvn=None):
        orig_shape = audio_spect.shape
        num_bin = orig_shape[-1]
        assert num_bin == self.nbin

        # Free metadata reshape (matches torch .view(-1, num_bin)); no HBM copy.
        x = jnp.reshape(audio_spect, (-1, num_bin)).astype(jnp.float32)   # (M, nbin)
        M = x.shape[0]
        N = self.nbank
        K = self.k_eff

        TM = _pick_tile_m(M)
        grid_m = _cdiv(M, TM)

        cmvn = (self._cmvn_identity if fbank_cmvn is None
                else jnp.asarray(fbank_cmvn, jnp.float32))              # (2, N)

        kernel = functools.partial(_fbank_kernel,
                                   use_power=bool(self.usePower),
                                   melfloor=self.melfloor)

        out = pl.pallas_call(
            kernel,
            out_shape=jax.ShapeDtypeStruct((M, N), self.out_dtype),
            grid_spec=pltpu.PrefetchScalarGridSpec(
                num_scalar_prefetch=0,
                grid=(grid_m,),
                in_specs=[
                    # Spectrum tile: reads only the first K columns of x
                    # directly from the unpadded (M, nbin) array.
                    pl.BlockSpec((TM, K), lambda i: (i, 0)),
                    # Filterbank weights (constant index map: fetched once,
                    # resident across grid steps).
                    pl.BlockSpec((K, N), lambda i: (0, 0)),
                    # cmvn (resident).
                    pl.BlockSpec((2, N), lambda i: (0, 0)),
                ],
                # Narrow (nbank-wide) output: last block dim == full extent,
                # so masked stores are used but HBM writeback is only the
                # useful 40 lanes and no XLA slice pass is needed afterwards.
                out_specs=pl.BlockSpec((TM, N), lambda i: (i, 0)),
            ),
            compiler_params=pltpu.CompilerParams(
                dimension_semantics=("parallel",)),
        )(x, self._w_t, cmvn)

        return jnp.reshape(out, orig_shape[:-1] + (N,))


# ------------------------------------------------------------------ driver --

def _reference(model, audio_spect, fbank_cmvn=None):
    x = jnp.reshape(audio_spect, (-1, model.nbin)).astype(jnp.float32)
    if not model.usePower:
        x = jnp.sqrt(x)
    fb = x @ model.weight.T            # full (nbank, nbin) weight, incl. bin 256
    fb = jnp.maximum(fb, model.melfloor)
    fb = jnp.log(fb)
    if fbank_cmvn is not None:
        fb = (fb + fbank_cmvn[0, :]) * fbank_cmvn[1, :]
    return jnp.reshape(fb, audio_spect.shape[:-1] + (model.nbank,))


if __name__ == "__main__":
    key = jax.random.PRNGKey(0)
    model = FbankModel()                       # nFFT=512 -> num_bin = 257, nbank = 40
    nbin = model.nbin

    k1, k2, k3, k4 = jax.random.split(key, 4)
    # power spectrum: non-negative; (batch=2, frames=8, bins=257)
    audio_spect = jax.random.uniform(k1, (2, 8, nbin), jnp.float32,
                                     minval=0.0, maxval=50.0)
    fbank_cmvn = jnp.stack([
        jax.random.normal(k2, (model.nbank,), jnp.float32) * 0.1,   # add
        jnp.ones((model.nbank,), jnp.float32) * 0.5,                # scale
    ], axis=0)

    # 1) no-cmvn path (default forward)
    out = jax.block_until_ready(model(audio_spect))
    ref = _reference(model, audio_spect)
    assert out.shape == (2, 8, model.nbank), out.shape
    np.testing.assert_allclose(np.asarray(out), np.asarray(ref), rtol=1e-5, atol=1e-5)

    # 2) cmvn path
    out_c = jax.block_until_ready(model(audio_spect, fbank_cmvn))
    ref_c = _reference(model, audio_spect, fbank_cmvn)
    np.testing.assert_allclose(np.asarray(out_c), np.asarray(ref_c), rtol=1e-5, atol=1e-5)

    # 3) usePower=1 with M not a tile multiple: partial last block's garbage
    #    rows go through matmul/log but are row-local and discarded by the
    #    masked boundary store.
    spect_3d = jax.random.uniform(k3, (1, 300, nbin), jnp.float32,
                                  minval=0.0, maxval=50.0)
    out_p = jax.block_until_ready(model(spect_3d, fbank_cmvn))
    ref_p = _reference(model, spect_3d, fbank_cmvn)
    assert out_p.shape == (1, 300, model.nbank), out_p.shape
    np.testing.assert_allclose(np.asarray(out_p), np.asarray(ref_p), rtol=1e-5, atol=1e-5)

    # 4) 2-D input, magnitude (sqrt) path, partial last tile.
    spect_2d = jax.random.uniform(k4, (300, nbin), jnp.float32,
                                  minval=0.0, maxval=50.0)
    model_mag = FbankModel(usePower=0)
    out_m = jax.block_until_ready(model_mag(spect_2d, fbank_cmvn))
    ref_m = _reference(model_mag, spect_2d, fbank_cmvn)
    assert out_m.shape == (300, model_mag.nbank), out_m.shape
    np.testing.assert_allclose(np.asarray(out_m), np.asarray(ref_m), rtol=1e-5, atol=1e-5)

    # 5) Opt-in fast path (bf16 MXU operands + bf16 output), looser tolerance.
    model_fast = FbankModel(bf16_mxu=True, out_dtype=jnp.bfloat16)
    out_f = jax.block_until_ready(model_fast(spect_3d, fbank_cmvn))
    np.testing.assert_allclose(np.asarray(out_f, dtype=np.float32), np.asarray(ref_p),
                               rtol=5e-2, atol=5e-2)

    print("KERNEL_OK")
</pallas_src>

<mosaic_0001>
module attributes {stable_mosaic.version = 11 : i64} {
  func.func @_fbank_kernel(%arg0: i32, %arg1: memref<16x256xf32, #tpu.memory_space<vmem>>, %arg2: memref<256x40xf32, #tpu.memory_space<vmem>>, %arg3: memref<2x40xf32, #tpu.memory_space<vmem>>, %arg4: memref<16x40xf32, #tpu.memory_space<vmem>>) attributes {dimension_semantics = [#tpu.dimension_semantics<parallel>], iteration_bounds = array<i64: 1>, scalar_prefetch = 0 : i64, scratch_operands = 0 : i64, tpu.core_type = #tpu.core_type<tc>, window_params = [{transform_indices = @transform_0, window_bounds = array<i64: 16, 256>}, {pipeline_mode = #tpu.pipeline_mode<synchronous>, transform_indices = @transform_1, window_bounds = array<i64: 256, 40>}, {pipeline_mode = #tpu.pipeline_mode<synchronous>, transform_indices = @transform_2, window_bounds = array<i64: 2, 40>}, {transform_indices = @transform_3, window_bounds = array<i64: 16, 40>}]} {
    %c0 = arith.constant 0 : index
    %c0_0 = arith.constant 0 : index
    %0 = vector.load %arg1[%c0, %c0_0] : memref<16x256xf32, #tpu.memory_space<vmem>>, vector<16x256xf32>
    %c0_1 = arith.constant 0 : index
    %c0_2 = arith.constant 0 : index
    %1 = vector.load %arg2[%c0_1, %c0_2] : memref<256x40xf32, #tpu.memory_space<vmem>>, vector<256x40xf32>
    %cst = arith.constant dense<0.000000e+00> : vector<16x40xf32>
    %2 = tpu.matmul %0, %1, %cst {dimension_numbers = #tpu.dot_dimension_numbers<[1], [0], [0], [1], [0, 0, 1, 1], [], []>} : vector<16x256xf32>, vector<256x40xf32>, vector<16x40xf32> -> vector<16x40xf32>
    %cst_3 = arith.constant 1.000000e+00 : f32
    %3 = vector.broadcast %cst_3 : f32 to vector<16x40xf32>
    %4 = arith.maximumf %2, %3 : vector<16x40xf32>
    %5 = math.log %4 : vector<16x40xf32>
    %c0_4 = arith.constant 0 : index
    %c0_5 = arith.constant 0 : index
    %6 = vector.load %arg3[%c0_4, %c0_5] : memref<2x40xf32, #tpu.memory_space<vmem>>, vector<1x40xf32>
    %c1 = arith.constant 1 : index
    %c0_6 = arith.constant 0 : index
    %7 = vector.load %arg3[%c1, %c0_6] : memref<2x40xf32, #tpu.memory_space<vmem>>, vector<1x40xf32>
    %8 = vector.broadcast %6 : vector<1x40xf32> to vector<16x40xf32>
    %9 = arith.addf %5, %8 : vector<16x40xf32>
    %10 = vector.broadcast %7 : vector<1x40xf32> to vector<16x40xf32>
    %11 = arith.mulf %9, %10 : vector<16x40xf32>
    %c0_7 = arith.constant 0 : index
    %c0_8 = arith.constant 0 : index
    %12 = vector.load %arg4[%c0_7, %c0_8] : memref<16x40xf32, #tpu.memory_space<vmem>>, vector<16x40xf32>
    tpu.vector_store %arg4[%c0_7, %c0_8], %11 {strides = array<i32>} : memref<16x40xf32, #tpu.memory_space<vmem>>, vector<16x40xf32>,
    return
  }
  func.func @transform_0(%arg0: i32) -> (i32, i32) {
    %c0_i32 = arith.constant 0 : i32
    %c0_i32_0 = arith.constant 0 : i32
    return %arg0, %c0_i32 : i32, i32
  }
  func.func @transform_1(%arg0: i32) -> (i32, i32) {
    %c0_i32 = arith.constant 0 : i32
    %c0_i32_0 = arith.constant 0 : i32
    %c0_i32_1 = arith.constant 0 : i32
    return %c0_i32, %c0_i32_0 : i32, i32
  }
  func.func @transform_2(%arg0: i32) -> (i32, i32) {
    %c0_i32 = arith.constant 0 : i32
    %c0_i32_0 = arith.constant 0 : i32
    %c0_i32_1 = arith.constant 0 : i32
    return %c0_i32, %c0_i32_0 : i32, i32
  }
  func.func @transform_3(%arg0: i32) -> (i32, i32) {
    %c0_i32 = arith.constant 0 : i32
    %c0_i32_0 = arith.constant 0 : i32
    return %arg0, %c0_i32 : i32, i32
  }
}

</mosaic_0001>

<bundles_post_ra>
// kernel: tpu_custom_call.1
= control target key start
LH: loop header
LB: loop body
LE: loop exit
PB: predicated region body
PF: predicated region fallthrough
CT: control target
= control target key end

     0   :  { %s462_s0 = inlined_call_operand.vmem [shape: f32[16,257], index: 0, kind: input, shape index: {}]   ;;  %s463_s1 = inlined_call_operand.vmem [shape: f32[256,40], index: 1, kind: input, shape index: {}]   ;;  %s464_s2 = inlined_call_operand.vmem [shape: f32[2,40], index: 2, kind: input, shape index: {}]   ;;  %s465_s3 = inlined_call_operand.hbm [shape: f32[16,40], index: 3, kind: output, shape index: {}]  }
   0x1   :  { %v60_v0 = vld [vmem:[%s463_s1 + $0x80] sm:$0xff]  ;;  %v61_v1 = vld [vmem:[%s463_s1 + $0x88] sm:$0xff]  ;;  %v62_v5 = vld [vmem:[%s463_s1 + $0x90] sm:$0xff] }
   0x2   :  { %v44_v2 = vld [vmem:[%s463_s1] sm:$0xff]  ;;  %v234_v3 = vpack.c.bf16 %v61_v1, %v60_v0  ;;  %v45_v4 = vld [vmem:[%s463_s1 + $0x8] sm:$0xff]  ;;  %v63_v6 = vld [vmem:[%s463_s1 + $0x98] sm:$0xff] }
   0x3   :  { %v236_v7 = vpack.c.bf16 %v45_v4, %v44_v2  ;;  %v238_v8 = vpack.c.bf16 %v63_v6, %v62_v5  ;;  %v46_v9 = vld [vmem:[%s463_s1 + $0x10] sm:$0xff]  ;;  %v47_v10 = vld [vmem:[%s463_s1 + $0x18] sm:$0xff]  ;;  %v64_v11 = vld [vmem:[%s463_s1 + $0xa0] sm:$0xff] }
   0x4   :  { %235 = vmatprep.subr.bf16.mxu0 %v234_v3  ;;  %266 = vmatprep.subr.bf16.mxu1 %v234_v3  ;;  %v65_v12 = vld [vmem:[%s463_s1 + $0xa8] sm:$0xff]  ;;  %v240_v13 = vpack.c.bf16 %v47_v10, %v46_v9  ;;  %v48_v15 = vld [vmem:[%s463_s1 + $0x20] sm:$0xff]  ;;  %v66_v17 = vld [vmem:[%s463_s1 + $0xb0] sm:$0xff] }
   0x5   :  { %237 = vmatpush3.bf16.msra.mxu0 %v236_v7  ;;  %274 = vmatpush3.bf16.msra.mxu1 %v236_v7  ;;  %v242_v14 = vpack.c.bf16 %v65_v12, %v64_v11  ;;  %v49_v16 = vld [vmem:[%s463_s1 + $0x28] sm:$0xff]  ;;  %v67_v18 = vld [vmem:[%s463_s1 + $0xb8] sm:$0xff]  ;;  %v50_v21 = vld [vmem:[%s463_s1 + $0x30] sm:$0xff] }
   0x6   :  { %239 = vmatprep.subr.bf16.mxu0 %v238_v8  ;;  %267 = vmatprep.subr.bf16.mxu1 %v238_v8  ;;  %v244_v19 = vpack.c.bf16 %v49_v16, %v48_v15  ;;  %v246_v20 = vpack.c.bf16 %v67_v18, %v66_v17  ;;  %v51_v22 = vld [vmem:[%s463_s1 + $0x38] sm:$0xff]  ;;  %v68_v23 = vld [vmem:[%s463_s1 + $0xc0] sm:$0xff]  ;;  %v69_v24 = vld [vmem:[%s463_s1 + $0xc8] sm:$0xff] }
   0x7   :  { %v25_v25 = vld [vmem:[%s462_s0 + $0x8] sm:$0xff]  ;;  %v29_v26 = vld [vmem:[%s462_s0 + $0x20] sm:$0xff]  ;;  %v248_v27 = vpack.c.bf16 %v51_v22, %v50_v21 }
   0x8   :  { %140 = vmatprep.mubr.f32.mxu0 %v25_v25 }
   0x9   :  { %241 = vmatpush3.bf16.msra.mxu0 %v240_v13  ;;  %275 = vmatpush3.bf16.msra.mxu1 %v240_v13 }
   0xa   :  { %243 = vmatprep.subr.bf16.mxu0 %v242_v14  ;;  %268 = vmatprep.subr.bf16.mxu1 %v242_v14 }
   0xd   :  { %245 = vmatpush3.bf16.msra.mxu0 %v244_v19  ;;  %276 = vmatpush3.bf16.msra.mxu1 %v244_v19 }
   0xe   :  { %8 = vsyncpa [#allocation4], 0  ;;  %247 = vmatprep.subr.bf16.mxu0 %v246_v20  ;;  %269 = vmatprep.subr.bf16.mxu1 %v246_v20  ;;  %v250_v28 = vpack.c.bf16 %v69_v24, %v68_v23  ;;  %v52_v29 = vld [vmem:[%s463_s1 + $0x40] sm:$0xff]  ;;  %v53_v30 = vld [vmem:[%s463_s1 + $0x48] sm:$0xff]  ;;  %s313_s5 = smov [#allocation3]   ;;  %vm171_vm0 = vcmask 326656  }
   0xf   :  { %v70_v31 = vld [vmem:[%s463_s1 + $0xd0] sm:$0xff]  ;;  %v71_v32 = vld [vmem:[%s463_s1 + $0xd8] sm:$0xff]  ;;  %145 = vmatprep.mubr.f32.mxu1 %v29_v26  ;;  %v252_v33 = vpack.c.bf16 %v53_v30, %v52_v29  ;;  %v72_v37 = vld [vmem:[%s463_s1 + $0xe0] sm:$0xff]  ;;  %s179_s6 = sshll.u32 %s313_s5, 4  ;;  %s180_s6 = int_to_ptr.vmem [resolvable:$true] %s179_s6 }
  0x10   :  { %v254_v34 = vpack.c.bf16 %v71_v32, %v70_v31  ;;  %v54_v35 = vld [vmem:[%s463_s1 + $0x50] sm:$0xff]  ;;  %v55_v36 = vld [vmem:[%s463_s1 + $0x58] sm:$0xff]  ;;  %v73_v38 = vld [vmem:[%s463_s1 + $0xe8] sm:$0xff]  ;;  %s289_s7 = scalar_lea.vmem %s180_s6, 256  ;;  %p294_p1 = scmp.lt.s32.totalorder %s180_s6, %s180_s6 }
  0x11   :  { %249 = vmatpush3.bf16.msra.mxu0 %v248_v27  ;;  %277 = vmatpush3.bf16.msra.mxu1 %v248_v27  ;;  %v256_v39 = vpack.c.bf16 %v55_v36, %v54_v35  ;;  %v258_v40 = vpack.c.bf16 %v73_v38, %v72_v37  ;;  %v56_v41 = vld [vmem:[%s463_s1 + $0x60] sm:$0xff]  ;;  %v57_v42 = vld [vmem:[%s463_s1 + $0x68] sm:$0xff]  ;;  %v74_v43 = vld [vmem:[%s463_s1 + $0xf0] sm:$0xff]  ;;  %p290_p0 = scmp.ne.s32.totalorder %s180_s6, %s289_s7  ;;  %p295_p2 = scmp.lt.s32.totalorder %s289_s7, %s289_s7 }
  0x12   :  { %251 = vmatprep.subr.bf16.mxu0 %v250_v28  ;;  %270 = vmatprep.subr.bf16.mxu1 %v250_v28  ;;  %v75_v44 = vld [vmem:[%s463_s1 + $0xf8] sm:$0xff]  ;;  %v260_v45 = vpack.c.bf16 %v57_v42, %v56_v41  ;;  %v58_v47 = vld [vmem:[%s463_s1 + $0x70] sm:$0xff]  ;;  %v23_v50 = vld [vmem:[%s462_s0] sm:$0xff] }
  0x13   :  { %v262_v46 = vpack.c.bf16 %v75_v44, %v74_v43  ;;  %v59_v48 = vld [vmem:[%s463_s1 + $0x78] sm:$0xff]  ;;  %v194_v61 = vld [vmem:[%s464_s2] ss:$0 sm:$0xff]  ;;  %v195_v0 = vld [vmem:[%s464_s2 + $0x1] ss:$0 sm:$0xff]  ;;  %p296_p3 = por %p295_p2, %p294_p1 }
  0x14   :  { %v264_v49 = vpack.c.bf16 %v59_v48, %v58_v47  ;;  %v27_v51 = vld [vmem:[%s462_s0 + $0x18] sm:$0xff] }
  0x15   :  { %253 = vmatpush3.bf16.msra.mxu0 %v252_v33  ;;  %278 = vmatpush3.bf16.msra.mxu1 %v252_v33  ;;  %p297_p4 = pnand %p296_p3, %p290_p0 }
  0x16   :  { %255 = vmatprep.subr.bf16.mxu0 %v254_v34  ;;  %271 = vmatprep.subr.bf16.mxu1 %v254_v34 }
  0x19   :  { %257 = vmatpush3.bf16.msra.mxu0 %v256_v39  ;;  %279 = vmatpush3.bf16.msra.mxu1 %v256_v39 }
  0x1a   :  { %259 = vmatprep.subr.bf16.mxu0 %v258_v40  ;;  %272 = vmatprep.subr.bf16.mxu1 %v258_v40 }
  0x1d   :  { %261 = vmatpush3.bf16.msra.mxu0 %v260_v45  ;;  %280 = vmatpush3.bf16.msra.mxu1 %v260_v45 }
  0x1e   :  { %263 = vmatprep.subr.bf16.mxu0 %v262_v46  ;;  %273 = vmatprep.subr.bf16.mxu1 %v262_v46 }
  0x21   :  { %265 = vmatpush3.bf16.msra.mxu0 %v264_v49  ;;  %281 = vmatpush3.bf16.msra.mxu1 %v264_v49 }
  0x24   :  { %141 = vmatmul.mubr.f32.vlgmr.msra.gmra.mrb[0].mxu0 %v23_v50  ;;  %146 = vmatmul.mubr.f32.vlgmr.msra.gmra.mrb[0].mxu1 %v27_v51 }
  0xf7   :  { %v228_v52 = vpop.f32.mrb[0].mxu0  ;;  %v231_v53 = vpop.f32.mrb[0].mxu1 }
  0xf8   :  { %v229_v54 = vpop.f32.mrb[1].mxu0  ;;  %v232_v55 = vpop.f32.mrb[1].mxu1 }
  0xf9   :  { %v230_v56 = vadd.f32 %v229_v54, %v228_v52  ;;  %v233_v57 = vadd.f32 %v232_v55, %v231_v53 }
  0xfb   :  { %v151_v58 = vmax.f32 %v230_v56, 1.0  ;;  %v152_v59 = vmax.f32 %v233_v57, 1.0 }
  0xfd   :  { %285 = vlog2.f32 %v151_v58 }
  0xfe   :  { %287 = vlog2.f32 %v152_v59 }
 0x107   :  { %v286_v60 = vpop.eup %285 }
 0x108   :  { %v288_v62 = vpop.eup %287  ;;  %v154_v63 = vmul.f32 0.6931472, %v286_v60 }
 0x109   :  { %v156_v1 = vmul.f32 0.6931472, %v288_v62 }
 0x10a   :  { %v163_v2 = vadd.f32 %v194_v61, %v154_v63 }
 0x10b   :  { %v164_v3 = vadd.f32 %v194_v61, %v156_v1 }
 0x10c   :  { %v169_v4 = vmul.f32 %v195_v0, %v163_v2 }
 0x10d   :  { %v170_v5 = vmul.f32 %v195_v0, %v164_v3 }
 0x10e   :  { %172 = vst.msk [vmem:[#allocation3] sm:$0xff] %vm171_vm0, %v169_v4 }
 0x10f   :  { %173 = vst.msk [vmem:[#allocation3 + $0x8] sm:$0xff] %vm171_vm0, %v170_v5 }
 0x110   :  { %300 = shalt.err (!%p297_p4)
}
 0x111   :  { %s301_s9 = scalar_lea.hbm %s465_s3, 256 }
 0x112   :  { %p302_p5 = scmp.ne.s32.totalorder %s465_s3, %s301_s9  ;;  %p305_p6 = scmp.lt.u32.totalorder %s301_s9, %s465_s3 }
 0x114   :  { %p307_p7 = pnand %p305_p6, %p302_p5 }
 0x116   :  { %310 = shalt.err (!%p307_p7)
}
 0x117   :  { %s314_s14 = smov 128   ;;  %s315_s15 = smov 8  }
 0x118   :  { %185 = dma.vmem_to_hbm [thread:$0]  %s180_s6, 256, %s465_s3, [#allocation4], %s314_s14, %s314_s14, %s315_s15  }
 0x119   :  { %311 = dma.done.wait [#allocation4], 256  }
 0x11a   :  { %312 = vsyncadd [#allocation4], 4294967040 }
 0x11b   :  { %189 = vsyncpa [#allocation4], 1 }

</bundles_post_ra>
